<compile_context>
chip_gen: v7x
topology: tpu7x:2x2x1
jax: 0.10.0
libtpu: 0.0.40
codegen_flags: <defaults>
</compile_context>

<pallas_src>
import functools

import jax
import jax.numpy as jnp
from jax.experimental import pallas as pl
from jax.experimental.pallas import tpu as pltpu

# AdaRound constants (match the PyTorch module)
GAMMA, ZETA = -0.1, 1.1
N_BITS = 8
N_LEVELS = 2 ** N_BITS

_LANE = 128
_SUBLANE = 8
_MAX_TF = 2048                    # max columns per tile (multiple of 128)
_TARGET_TILE_ELEMS = 512 * 1024   # ~2 MiB f32 per array per block


def _cdiv(a, b):
    return (a + b - 1) // b


def _round_up(x, m):
    return ((x + m - 1) // m) * m


def _choose_tiling(oc, f):
    """Pick (tm, tf, n_row, n_col).

    Invariants (so every BlockSpec is legal without padding the arrays):
      * tf is a multiple of 128, or tf == f (full lane dim).
      * tm is a multiple of 8,   or tm == oc (full sublane dim).
    Edge blocks may be partial; Pallas masks their stores.
    """
    # Lane (F) axis.
    if f <= _LANE:
        tf, n_col = f, 1
    else:
        n_col = _cdiv(f, _MAX_TF)
        tf = min(_round_up(_cdiv(f, n_col), _LANE), _MAX_TF)
        tf = min(tf, f)                       # == f only when n_col would be 1
        n_col = _cdiv(f, tf)

    # Sublane (OC) axis.
    if oc <= _SUBLANE:
        tm, n_row = oc, 1
    else:
        oc8 = _round_up(oc, _SUBLANE)
        tm_cap = max(_SUBLANE,
                     min(oc8, (_TARGET_TILE_ELEMS // tf) // _SUBLANE * _SUBLANE))
        n_row = _cdiv(oc, tm_cap)
        tm = min(_round_up(_cdiv(oc, n_row), _SUBLANE), oc)
        n_row = _cdiv(oc, tm)

        # Keep >= 2 grid steps so both v7x TensorCores get work.
        if n_row * n_col < 2 and oc >= 2 * _SUBLANE:
            tm = min(_round_up(_cdiv(oc, 2), _SUBLANE), oc)
            n_row = _cdiv(oc, tm)

    return tm, tf, n_row, n_col


def _adaround_kernel(x_ref, alpha_ref, delta_ref, zp_ref, out_ref,
                     *, soft_targets: bool, n_levels: int):
    """Elementwise AdaRound quantize/dequantize for one (tm, tf) tile.

    x_ref, alpha_ref, out_ref : (tm, tf) f32
    delta_ref, zp_ref         : (tm, 1) f32  (per-output-channel, broadcast over F)
    """
    x = x_ref[...]
    alpha = alpha_ref[...]
    delta = delta_ref[...]        # (tm, 1) broadcasts against (tm, tf)
    zp = zp_ref[...]

    # Exact division kept on purpose so floor(x/delta) matches the reference at
    # integer boundaries.
    x_floor = jnp.floor(x / delta)

    if soft_targets:
        # clamp(sigmoid(alpha) * (zeta - gamma) + gamma, 0, 1)
        h = jnp.clip(jax.nn.sigmoid(alpha) * (ZETA - GAMMA) + GAMMA, 0.0, 1.0)
    else:
        # hard rounding decision: (alpha >= 0).float()
        h = (alpha >= 0).astype(x.dtype)

    x_quant = jnp.clip(x_floor + h + zp, 0.0, float(n_levels - 1))
    out_ref[...] = ((x_quant - zp) * delta).astype(out_ref.dtype)


def adaround_quantize(x, alpha, delta_oc, zp_oc,
                      *, soft_targets=False, n_levels=N_LEVELS):
    """AdaRound forward pass (learned_hard_sigmoid).

    x, alpha        : (OC, ...) f32, same shape (conv OIHW or linear OI)
    delta_oc, zp_oc : per-output-channel quant params, shape (OC,) or scalar
    """
    orig_shape = x.shape
    oc = orig_shape[0]
    x2d = x.reshape(oc, -1)
    a2d = alpha.reshape(oc, -1)
    f = x2d.shape[1]
    dtype = x2d.dtype

    d2d = jnp.broadcast_to(jnp.asarray(delta_oc, dtype).reshape(-1), (oc,)).reshape(oc, 1)
    z2d = jnp.broadcast_to(jnp.asarray(zp_oc, dtype).reshape(-1), (oc,)).reshape(oc, 1)

    tm, tf, n_row, n_col = _choose_tiling(oc, f)

    kernel = functools.partial(
        _adaround_kernel, soft_targets=soft_targets, n_levels=n_levels)

    tile_spec = pl.BlockSpec((tm, tf), lambda i, j: (i, j))
    # Block index for params ignores the inner (F) grid axis -> DMA elided across it.
    param_spec = pl.BlockSpec((tm, 1), lambda i, j: (i, 0))

    # VMEM budget: 3 pipelined (tm, tf) arrays, double-buffered, plus tiny params.
    tile_bytes = tm * tf * dtype.itemsize
    param_bytes = _round_up(tm, _SUBLANE) * _LANE * dtype.itemsize  # (tm,1) pads to a lane tile
    vmem_needed = 3 * 2 * tile_bytes + 2 * 2 * param_bytes + (1 << 20)
    vmem_limit = int(min(64 * 2**20, max(32 * 2**20, vmem_needed + 8 * 2**20)))

    n_elems = oc * f
    cost = pl.CostEstimate(
        flops=8 * n_elems,
        transcendentals=(n_elems if soft_targets else 0),
        bytes_accessed=(3 * n_elems + 4 * oc) * dtype.itemsize,
    )

    out2d = pl.pallas_call(
        kernel,
        out_shape=jax.ShapeDtypeStruct((oc, f), dtype),
        grid_spec=pltpu.PrefetchScalarGridSpec(
            num_scalar_prefetch=0,
            grid=(n_row, n_col),
            in_specs=[tile_spec, tile_spec, param_spec, param_spec],
            out_specs=tile_spec,
        ),
        compiler_params=pltpu.CompilerParams(
            dimension_semantics=("parallel", "parallel"),
            vmem_limit_bytes=vmem_limit),
        cost_estimate=cost,
    )(x2d, a2d, d2d, z2d)

    return out2d.reshape(orig_shape)


def init_alpha(x, delta_oc):
    """AdaRoundQuantizer.init_alpha (learned_hard_sigmoid): plain-JAX param setup."""
    delta = delta_oc.reshape((-1,) + (1,) * (x.ndim - 1))
    x_floor = jnp.floor(x / delta)
    rest = x / delta - x_floor
    # rest is in [0, 1); with gamma=-0.1, zeta=1.1 the log argument is positive.
    alpha = -jnp.log((ZETA - GAMMA) / (rest - GAMMA) - 1.0)
    return alpha


def reference_forward(x, alpha, delta_oc, zp_oc,
                      *, soft_targets=False, n_levels=N_LEVELS):
    """Pure-JAX reference mirroring the PyTorch forward (learned_hard_sigmoid)."""
    delta = delta_oc.reshape((-1,) + (1,) * (x.ndim - 1))
    zp = zp_oc.reshape((-1,) + (1,) * (x.ndim - 1))
    x_floor = jnp.floor(x / delta)
    if soft_targets:
        h = jnp.clip(jax.nn.sigmoid(alpha) * (ZETA - GAMMA) + GAMMA, 0.0, 1.0)
    else:
        h = (alpha >= 0).astype(x.dtype)
    x_int = x_floor + h
    x_quant = jnp.clip(x_int + zp, 0.0, float(n_levels - 1))
    return (x_quant - zp) * delta


if __name__ == "__main__":
    key = jax.random.PRNGKey(0)

    # Small conv-weight-like configs; the 2nd/3rd exercise ragged edge blocks
    # (OC not a multiple of the row tile, F not a multiple of 128).
    configs = [(16, 4, 3, 3), (24, 8, 3, 3), (10, 3, 3, 3)]

    for idx, (OC, IC, KH, KW) in enumerate(configs):
        k1 = jax.random.fold_in(key, idx)
        x = jax.random.normal(k1, (OC, IC, KH, KW), dtype=jnp.float32) * 0.5

        # Deterministic per-channel quant params (as a UniformAffineQuantizer
        # would have produced): delta from per-channel max-abs, asymmetric zp.
        x_absmax = jnp.max(jnp.abs(x.reshape(OC, -1)), axis=1)
        delta_oc = (2.0 * x_absmax) / (N_LEVELS - 1)
        zp_oc = jnp.round(x_absmax / delta_oc)

        # alpha initialized exactly as AdaRoundQuantizer.init_alpha does.
        alpha = init_alpha(x, delta_oc)

        # Hard-rounding path (soft_targets=False) and soft path (soft_targets=True)
        out_hard = adaround_quantize(x, alpha, delta_oc, zp_oc, soft_targets=False)
        out_soft = adaround_quantize(x, alpha, delta_oc, zp_oc, soft_targets=True)
        jax.block_until_ready((out_hard, out_soft))

        ref_hard = reference_forward(x, alpha, delta_oc, zp_oc, soft_targets=False)
        ref_soft = reference_forward(x, alpha, delta_oc, zp_oc, soft_targets=True)

        assert out_hard.shape == x.shape and out_hard.dtype == x.dtype
        assert out_soft.shape == x.shape and out_soft.dtype == x.dtype
        assert jnp.allclose(out_hard, ref_hard, atol=1e-5, rtol=1e-5)
        assert jnp.allclose(out_soft, ref_soft, atol=1e-5, rtol=1e-5)

    # TODO(synk): 'stochastic' round_mode (torch.bernoulli) and plain 'nearest'
    # modes are not kernelized; BRECQ's optimized path is 'learned_hard_sigmoid',
    # which is what this kernel implements (both soft- and hard-target branches).
    print("KERNEL_OK")
</pallas_src>

<mosaic_0001>
module attributes {stable_mosaic.version = 11 : i64} {
  func.func @_adaround_kernel(%arg0: i32, %arg1: i32, %arg2: memref<8x36xf32, #tpu.memory_space<vmem>>, %arg3: memref<8x36xf32, #tpu.memory_space<vmem>>, %arg4: memref<8x1xf32, #tpu.memory_space<vmem>>, %arg5: memref<8x1xf32, #tpu.memory_space<vmem>>, %arg6: memref<8x36xf32, #tpu.memory_space<vmem>>) attributes {dimension_semantics = [#tpu.dimension_semantics<parallel>, #tpu.dimension_semantics<parallel>], iteration_bounds = array<i64: 2, 1>, scalar_prefetch = 0 : i64, scratch_operands = 0 : i64, tpu.core_type = #tpu.core_type<tc>, window_params = [{transform_indices = @transform_0, window_bounds = array<i64: 8, 36>}, {transform_indices = @transform_1, window_bounds = array<i64: 8, 36>}, {transform_indices = @transform_2, window_bounds = array<i64: 8, 1>}, {transform_indices = @transform_3, window_bounds = array<i64: 8, 1>}, {transform_indices = @transform_4, window_bounds = array<i64: 8, 36>}]} {
    %c0 = arith.constant 0 : index
    %c0_0 = arith.constant 0 : index
    %0 = vector.load %arg2[%c0, %c0_0] : memref<8x36xf32, #tpu.memory_space<vmem>>, vector<8x36xf32>
    %c0_1 = arith.constant 0 : index
    %c0_2 = arith.constant 0 : index
    %1 = vector.load %arg3[%c0_1, %c0_2] : memref<8x36xf32, #tpu.memory_space<vmem>>, vector<8x36xf32>
    %c0_3 = arith.constant 0 : index
    %c0_4 = arith.constant 0 : index
    %2 = vector.load %arg4[%c0_3, %c0_4] : memref<8x1xf32, #tpu.memory_space<vmem>>, vector<8x1xf32>
    %c0_5 = arith.constant 0 : index
    %c0_6 = arith.constant 0 : index
    %3 = vector.load %arg5[%c0_5, %c0_6] : memref<8x1xf32, #tpu.memory_space<vmem>>, vector<8x1xf32>
    %4 = vector.broadcast %2 : vector<8x1xf32> to vector<8x36xf32>
    %5 = arith.divf %0, %4 : vector<8x36xf32>
    %6 = math.floor %5 : vector<8x36xf32>
    %cst = arith.constant 0.000000e+00 : f32
    %7 = vector.broadcast %cst : f32 to vector<8x36xf32>
    %8 = arith.cmpf oge, %1, %7 : vector<8x36xf32>
    %9 = arith.extui %8 : vector<8x36xi1> to vector<8x36xi32>
    %10 = arith.sitofp %9 : vector<8x36xi32> to vector<8x36xf32>
    %11 = arith.addf %6, %10 : vector<8x36xf32>
    %12 = vector.broadcast %3 : vector<8x1xf32> to vector<8x36xf32>
    %13 = arith.addf %11, %12 : vector<8x36xf32>
    %cst_7 = arith.constant 0.000000e+00 : f32
    %cst_8 = arith.constant 2.550000e+02 : f32
    %14 = vector.broadcast %cst_7 : f32 to vector<8x36xf32>
    %15 = arith.maximumf %14, %13 : vector<8x36xf32>
    %16 = vector.broadcast %cst_8 : f32 to vector<8x36xf32>
    %17 = arith.minimumf %16, %15 : vector<8x36xf32>
    %18 = vector.broadcast %3 : vector<8x1xf32> to vector<8x36xf32>
    %19 = arith.subf %17, %18 : vector<8x36xf32>
    %20 = vector.broadcast %2 : vector<8x1xf32> to vector<8x36xf32>
    %21 = arith.mulf %19, %20 : vector<8x36xf32>
    %c0_9 = arith.constant 0 : index
    %c0_10 = arith.constant 0 : index
    %22 = vector.load %arg6[%c0_9, %c0_10] : memref<8x36xf32, #tpu.memory_space<vmem>>, vector<8x36xf32>
    tpu.vector_store %arg6[%c0_9, %c0_10], %21 {strides = array<i32>} : memref<8x36xf32, #tpu.memory_space<vmem>>, vector<8x36xf32>,
    return
  }
  func.func @transform_0(%arg0: i32, %arg1: i32) -> (i32, i32) {
    %c0_i32 = arith.constant 0 : i32
    return %arg0, %arg1 : i32, i32
  }
  func.func @transform_1(%arg0: i32, %arg1: i32) -> (i32, i32) {
    %c0_i32 = arith.constant 0 : i32
    return %arg0, %arg1 : i32, i32
  }
  func.func @transform_2(%arg0: i32, %arg1: i32) -> (i32, i32) {
    %c0_i32 = arith.constant 0 : i32
    %c0_i32_0 = arith.constant 0 : i32
    return %arg0, %c0_i32 : i32, i32
  }
  func.func @transform_3(%arg0: i32, %arg1: i32) -> (i32, i32) {
    %c0_i32 = arith.constant 0 : i32
    %c0_i32_0 = arith.constant 0 : i32
    return %arg0, %c0_i32 : i32, i32
  }
  func.func @transform_4(%arg0: i32, %arg1: i32) -> (i32, i32) {
    %c0_i32 = arith.constant 0 : i32
    return %arg0, %arg1 : i32, i32
  }
}

</mosaic_0001>

<bundles_post_ra>
// kernel: tpu_custom_call.1
= control target key start
LH: loop header
LB: loop body
LE: loop exit
PB: predicated region body
PF: predicated region fallthrough
CT: control target
= control target key end

     0   :  { %9 = vsyncpa [#allocation3], 0  ;;  %s737_s0 = inlined_call_operand.vmem [shape: f32[16,36], index: 0, kind: input, shape index: {}]   ;;  %s738_s1 = inlined_call_operand.vmem [shape: f32[16,36], index: 1, kind: input, shape index: {}]   ;;  %s739_s2 = inlined_call_operand.vmem [shape: f32[16,1], index: 2, kind: input, shape index: {}]   ;;  %s740_s3 = inlined_call_operand.vmem [shape: f32[16,1], index: 3, kind: input, shape index: {}]   ;;  %s741_s4 = inlined_call_operand.hbm [shape: f32[16,36], index: 4, kind: output, shape index: {}]  }
   0x1   :  { %11 = vsyncpa [#allocation3 + $0x1], 0  ;;  %s616_s15 = smov 0   ;;  %s618_s16 = smov 0  }
   0x2   :  { %s620_s17 = smov 0   ;;  %s622_s18 = smov 0  }
   0x3   :  { %s624_s19 = smov 0   ;;  %s626_s20 = smov 0  }
   0x4 LB: > { %s433_s21 = sadd.s32 4294967295, %s586_s20   ;;  %s434_s22 = sadd.s32 4294967294, %s586_s20   ;;  %s586_s20 = sphi %s626_s20, %s17_s20   ;;  %s582_s19 = sphi %s624_s19, %s748_s19   ;;  %s578_s18 = sphi %s622_s18, %s747_s18   ;;  %s574_s17 = sphi %s620_s17, %s746_s17   ;;  %s570_s16 = sphi %s618_s16, %s745_s16   ;;  %s566_s15 = sphi %s616_s15, %s744_s15  }
   0x5   : > { %s29_s23 = sadd.s32 1, %s582_s19  ;;  %s146_s24 = sadd.s32 1, %s574_s17 }
   0x6   : > { %p31_p0 = scmp.ge.s32.totalorder %s29_s23, 2  ;;  %p156_p1 = scmp.ne.s32.totalorder %s574_s17, %s570_s16 }
   0x7   : > { %p157_p2 = scmp.eq.s32.totalorder %s433_s21, 1  ;;  %p162_p3 = scmp.ne.s32.totalorder %s570_s16, %s566_s15 }
   0x8   : > { %s750_s23 = smov (%p31_p0, %s29_s23), 0  ;;  %p163_p5 = scmp.eq.s32.totalorder %s434_s22, 1 }
   0x9   : > { %p656_p4 = por %p157_p2, %p156_p1  ;;  %s141_s26 = ssub.s32 %s582_s19, %s750_s23 }
   0xa   : > { %p437_p6 = scmp.ge.s32.totalorder %s586_s20, 1  ;;  %p144_p7 = scmp.eq.s32.totalorder %s141_s26, 0 }
   0xb   : > { %p663_p8 = por %p163_p5, %p162_p3  ;;  %p215_p9 = scmp.lt.s32.totalorder %s586_s20, 3 }
   0xc   : > { %s669_s28 = scalar_select %p144_p7, %s574_s17, %s146_s24  }
   0xd   : > { %p216_p10 = pnand %p437_p6, %p215_p9 }
   0xe   : > { %p258_p11 = scmp.lt.s32.totalorder (!%p216_p10), %s578_s18, 1  ;;  %v588_v0 = vmov (!%p216_p10), 0   ;;  %v589_v8 = vmov (!%p216_p10), 0.0   ;;  %s255_s24 = sand.u32 (!%p216_p10), 1, %s570_s16   ;;  %vm306_vm1 = vcmask (!%p216_p10), 293888  }
   0xf   : > { %219 = sbr.rel (%p216_p10) target bundleno = 196 (0xc4), region = 36  ;;  %505 = vset.pattern.permute.xlu0 (!%p216_p10), %v588_v0  ;;  %s438_s26 = sshll.u32 (!%p216_p10), %s255_s24, 3 }
  0x10   : > { %s257_s5 = scalar_lea.vmem (!%p216_p10), [#allocation2], %s438_s26  ;;  %s309_s9 = scalar_lea.sflag (!%p216_p10), [#allocation3], %s255_s24 }
  0x16   : > { %s259_s29 = scalar_select %p258_p11, %s578_s18, 1 }
  0x18   : > { %s439_s30 = sshll.u32 %s259_s29, 3  ;;  %s445_s29 = sshll.u32 %s578_s18, 7 }
  0x19   : > { %s275_s7 = scalar_lea.vmem %s739_s2, %s439_s30  ;;  %s279_s10 = scalar_lea.vmem %s740_s3, %s439_s30 }
  0x1a   : > { %v282_v1 = vld [vmem:[%s275_s7] sm:$0xff]  ;;  %s271_s13 = scalar_lea.vmem %s738_s1, %s439_s30  ;;  %s264_s22 = scalar_lea.vmem %s737_s0, %s439_s30 }
  0x1b   : > { %286 = vperm.xlu0 %505, %v282_v1   ;;  %v283_v2 = vld [vmem:[%s279_s10] sm:$0xff]  ;;  %s323_s30 = sshll.u32 %s257_s5, 4  ;;  %s690_s8 = scalar_lea.hbm %s741_s4, %s445_s29  ;;  %s692_s30 = int_to_ptr.vmem [resolvable:$true] %s323_s30 }
  0x1c   : > { %v281_v4 = vld [vmem:[%s271_s13] sm:$0xff]  ;;  %s508_s10 = scalar_lea.vmem %s692_s30, 128  ;;  %s590_s18 = smov [#allocation2]  }
  0x1d   : > { %v280_v5 = vld [vmem:[%s264_s22] sm:$0xff]  ;;  %vm292_vm0 = vcmp.ge.f32.partialorder %v281_v4, 0.0  ;;  %p509_p12 = scmp.ne.s32.totalorder %s692_s30, %s508_s10  ;;  %s512_s11 = sshll.u32 %s590_s18, 4  ;;  %s513_s11 = int_to_ptr.vmem [resolvable:$false] %s512_s11 }
  0x1e   : > { %v443_v9 = vsel %vm292_vm0, 1.0, %v589_v8  ;;  %s514_s12 = scalar_lea.vmem %s513_s11, 256  ;;  %p515_p1 = scmp.lt.s32.totalorder %s692_s30, %s513_s11 }
  0x1f   : > { %298 = vperm.xlu0 %505, %v283_v2   ;;  %p510_p13 = pnand %p509_p12, %p656_p4  ;;  %p516_p2 = scmp.lt.s32.totalorder %s514_s12, %s508_s10 }
  0x21   : > { %p511_p0 = pneg %p510_p13  ;;  %p517_p3 = por %p516_p2, %p515_p1 }
  0x23   : > { %p518_p5 = pnand %p517_p3, %p511_p0 }
  0x9a   : > { %v287_v3 = vpop.permute.xlu0 %286 }
  0x9b   : > { %506 = vrcp.f32 %v287_v3 }
  0x9e   : > { %v299_v12 = vpop.permute.xlu0 %298 }
  0xa5   : > { %v507_v6 = vpop.eup %506 }
  0xa6   : > { %v290_v7 = vmul.f32 %v507_v6, %v280_v5 }
  0xa8   : > { %v291_v10 = vfloor.f32 %v290_v7 }
  0xaa   : > { %v295_v11 = vadd.f32 %v443_v9, %v291_v10 }
  0xac   : > { %v301_v13 = vadd.f32 %v299_v12, %v295_v11 }
  0xae   : > { %v302_v14 = vmax.f32 %v301_v13, 0.0 }
  0xb0   : > { %v303_v15 = vmin.f32 %v302_v14, 255.0 }
  0xb2   : > { %v304_v16 = vsub.f32 %v303_v15, %v299_v12 }
  0xb4   : > { %v305_v17 = vmul.f32 %v304_v16, %v287_v3 }
  0xb6   : > { %307 = vst.msk [vmem:[%s257_s5] sm:$0xff] %vm306_vm1, %v305_v17 }
  0xb7   : > { %521 = shalt.err (!%p518_p5)
}
  0xb8   : > { %s522_s13 = scalar_lea.hbm %s690_s8, 128  ;;  %s526_s22 = scalar_lea.hbm %s741_s4, 256 }
  0xb9   : > { %p523_p6 = scmp.ne.s32.totalorder %s690_s8, %s522_s13  ;;  %p527_p10 = scmp.lt.u32.totalorder %s690_s8, %s741_s4 }
  0xba   : > { %p528_p11 = scmp.lt.u32.totalorder %s526_s22, %s522_s13  ;;  %p530_p13 = scmp.lt.u32.totalorder %s522_s13, %s690_s8 }
  0xbb   : > { %p524_p7 = pnand %p523_p6, %p656_p4 }
  0xbc   : > { %p529_p12 = por %p528_p11, %p527_p10 }
  0xbd   : > { %p525_p9 = pneg %p524_p7 }
  0xbe   : > { %p531_p0 = por %p530_p13, %p529_p12 }
  0xc0   : > { %p532_p1 = pnand %p531_p0, %p525_p9 }
  0xc2   : > { %535 = shalt.err (!%p532_p1)
}
  0xc3   : > { %448 = dma.vmem_to_hbm [thread:$0]  (%p656_p4), %s692_s30, 128, %s690_s8, %s309_s9  }
  0xc4 PF: > { %p454_p2 = scmp.ge.s32.totalorder %s586_s20, 2  ;;  %s335_s29 = sand.u32 1, %s566_s15  }
  0xc5   : > { %s336_s5 = scalar_lea.sflag [#allocation3], %s335_s29 }
  0xc6   : > { %p451_p3 = pnand %p454_p2, %p663_p8 }
  0xc8   : > { %561 = dma.done.wait (!%p451_p3), %s336_s5, 128  }
  0xc9   : > { %563 = vsyncadd (!%p451_p3), %s336_s5, 4294967168  ;;  %s17_s20 = sadd.s32 1, %s586_s20   ;;  %s744_s15 = smov %s570_s16 }
  0xca   : > { %p14_p5 = scmp.ge.s32.totalorder %s17_s20, 4   ;;  %s745_s16 = smov %s574_s17 }
  0xcb   : > { %s746_s17 = smov %s669_s28  ;;  %s747_s18 = smov %s582_s19 }
  0xcc   : > { %s748_s19 = smov %s750_s23  ;;  %16 = sbr.rel (!%p14_p5) target bundleno = 4 (0x4), region = 80 }
  0xd3   :  { %341 = vsyncpa [#allocation3], 1 }
  0xd4   :  { %343 = vsyncpa [#allocation3 + $0x1], 1 }

</bundles_post_ra>
